<compile_context>
chip_gen: v7x
topology: tpu7x:2x2x1
jax: 0.10.0
libtpu: 0.0.40
codegen_flags: <defaults>
</compile_context>

<pallas_src>
import jax
import jax.numpy as jnp
from jax.experimental import pallas as pl
from jax.experimental.pallas import tpu as pltpu

NUM_CONCAT = 8   # torch.concat(bert_outputs['hidden_states'][-8:], dim=-1)
LANE = 128


# ----------------------------- Pallas kernel ---------------------------------
def fused_concat_bmm_kernel(t_ref, *rest):
    """One batch element per grid step (batch dim squeezed by the BlockSpecs).

    t_ref   : [WL, BLp]      bf16  transform matrix (K zero-padded to BLp)
    h_refs  : 8 x [BLp, H]   bf16  last 8 hidden states (K zero-padded)
    o_ref   : [WL, 8*H]      f32   embeddings for this batch element
    rhs_ref : [BLp, 8*H]     bf16  VMEM scratch holding the fused concat
    """
    h_refs = rest[:NUM_CONCAT]
    o_ref = rest[NUM_CONCAT]
    rhs_ref = rest[NUM_CONCAT + 1]
    H = h_refs[0].shape[-1]

    # Fuse the feature-axis concat: copy each hidden tile into its 128-aligned
    # column slab of the VMEM scratch (cheap VMEM->VMEM stores), so the MXU
    # sees a single wide-N dot instead of 8 narrow N=H dots.
    for l, h_ref in enumerate(h_refs):
        rhs_ref[:, l * H:(l + 1) * H] = h_ref[...]

    # [WL, BLp] x [BLp, 8H] -> [WL, 8H]: bf16 inputs, f32 MXU accumulation,
    # one unmasked lane-dense store of the whole output tile.
    o_ref[...] = jnp.dot(
        t_ref[...], rhs_ref[...], preferred_element_type=jnp.float32
    ).astype(o_ref.dtype)


def fused_concat_bmm(transforms, hidden_states, *, out_dtype=jnp.float32):
    """embeddings[b] = transforms[b] @ concat(hidden_states, -1)[b]  (Pallas)."""
    assert len(hidden_states) == NUM_CONCAT
    B, WL, BL = transforms.shape
    H = hidden_states[0].shape[-1]
    assert all(h.shape == (B, BL, H) for h in hidden_states)
    # Lane-aligned per-layer column slabs (real BERT H = 768 = 6*128 is fine).
    assert H % LANE == 0, "hidden size must be a multiple of 128"
    D = NUM_CONCAT * H

    # Zero-pad the contraction axis to a lane multiple: lane-dense LHS tile,
    # full-K MXU columns, exact result (pad region is zero).  Skipped entirely
    # at real BERT subword lengths (BL = 512).
    BLp = pl.cdiv(BL, LANE) * LANE
    pad_k = BLp - BL
    t_p = transforms.astype(jnp.bfloat16)          # tiny: B*WL*BL elements
    h_p = [h.astype(jnp.bfloat16) for h in hidden_states]  # already bf16 -> no-op
    if pad_k:
        t_p = jnp.pad(t_p, ((0, 0), (0, 0), (0, pad_k)))
        h_p = [jnp.pad(h, ((0, 0), (0, pad_k), (0, 0))) for h in h_p]

    out_itemsize = jnp.dtype(out_dtype).itemsize
    in_bytes = B * WL * BLp * 2 + NUM_CONCAT * B * BLp * H * 2
    out_bytes = B * WL * D * out_itemsize
    cost = pl.CostEstimate(flops=2 * B * WL * BLp * D,
                           bytes_accessed=in_bytes + out_bytes,
                           transcendentals=0)

    # Explicit VMEM budget: double-buffered input/output tiles + the scratch.
    tile_in = WL * BLp * 2 + NUM_CONCAT * BLp * H * 2
    tile_out = WL * D * out_itemsize
    scratch_bytes = BLp * D * 2
    vmem_limit = 2 * (tile_in + tile_out) + scratch_bytes + (4 << 20)
    vmem_limit = int(min(max(vmem_limit, 16 << 20), 100 << 20))

    grid_spec = pltpu.PrefetchScalarGridSpec(
        num_scalar_prefetch=0,
        grid=(B,),  # one batch element per grid step -> auto double buffering
        in_specs=(
            [pl.BlockSpec((None, WL, BLp), lambda b: (b, 0, 0))]
            + [pl.BlockSpec((None, BLp, H), lambda b: (b, 0, 0))
               for _ in range(NUM_CONCAT)]
        ),
        out_specs=pl.BlockSpec((None, WL, D), lambda b: (b, 0, 0)),
        scratch_shapes=[pltpu.VMEM((BLp, D), jnp.bfloat16)],
    )

    return pl.pallas_call(
        fused_concat_bmm_kernel,
        out_shape=jax.ShapeDtypeStruct((B, WL, D), out_dtype),
        grid_spec=grid_spec,
        compiler_params=pltpu.CompilerParams(
            dimension_semantics=("parallel",),   # v7x: shard batch over 2 TCs
            vmem_limit_bytes=vmem_limit),
        cost_estimate=cost,
    )(t_p, *h_p)


# ------------------------- synthetic "BERT" stand-in --------------------------
# TODO(synk): AutoModel.from_pretrained(args.bert_type) cannot be reproduced;
# this deterministic embedding + tanh-linear stack is a stand-in that yields
# `output_hidden_states`-style tensors of the right shapes.
def make_synthetic_bert_params(key, vocab_size, hidden_size, num_layers):
    keys = jax.random.split(key, 1 + num_layers)
    emb = jax.random.normal(keys[0], (vocab_size, hidden_size), jnp.float32) * 0.02
    W = jnp.stack(
        [jax.random.normal(keys[1 + l], (hidden_size, hidden_size), jnp.float32) * 0.02
         for l in range(num_layers)])
    b = jnp.zeros((num_layers, hidden_size), jnp.float32)
    return {"emb": emb, "W": W, "b": b}


def synthetic_bert_hidden_states(indices, attention_mask, params,
                                 out_dtype=jnp.bfloat16):
    """Internal compute in f32; each hidden state is emitted in `out_dtype`.

    Emitting bf16 at the producer removes the wrapper-side cast pass over HBM
    (the kernel's dominant input stream) that the perf review flagged.
    """
    emb = params["emb"]
    h = emb[indices]                                   # [B, BL, H] f32
    mask = attention_mask[..., None].astype(h.dtype)
    h = h * mask
    hidden_states = [h.astype(out_dtype)]
    num_layers = params["W"].shape[0]
    for l in range(num_layers):
        h = jnp.tanh(h @ params["W"][l] + params["b"][l]) * mask
        hidden_states.append(h.astype(out_dtype))
    return hidden_states


# ------------------------------ forward pass ----------------------------------
def bert_embedding_forward(inputs, params):
    BL = inputs["bert_longest_length"]
    WL = inputs["word_longest_length"]
    indices = inputs["indices"][:, :BL]                   # [B, BL] int32
    attention_mask = inputs["attention_mask"][:, :BL]     # [B, BL]
    hidden_states = synthetic_bert_hidden_states(
        indices, attention_mask, params, out_dtype=jnp.bfloat16)
    transforms = inputs["transform_matrix"][:, :WL, :BL]  # [B, WL, BL]
    # concat of the last 8 hidden states + bmm, fused inside the Pallas kernel.
    return fused_concat_bmm(transforms, hidden_states[-NUM_CONCAT:])


if __name__ == "__main__":
    key = jax.random.PRNGKey(0)
    k_par, k_idx, k_tr = jax.random.split(key, 3)

    # small shapes consistent with the forward pass
    B = 2            # batch
    MAX_BL = 16      # max subword (BERT) length
    MAX_WL = 8       # max word length
    BL = 16          # bert_longest_length
    WL = 8           # word_longest_length
    H = 128          # stand-in hidden size (multiple of 128; real BERT is 768)
    VOCAB = 100
    NUM_LAYERS = 8   # so hidden_states[-8:] exists

    params = make_synthetic_bert_params(k_par, VOCAB, H, NUM_LAYERS)

    indices = jax.random.randint(k_idx, (B, MAX_BL), 0, VOCAB, dtype=jnp.int32)
    attention_mask = jnp.ones((B, MAX_BL), jnp.float32)
    transform_matrix = jax.random.normal(k_tr, (B, MAX_WL, MAX_BL), jnp.float32)

    inputs = {
        "bert_longest_length": BL,
        "word_longest_length": WL,
        "indices": indices,
        "attention_mask": attention_mask,
        "transform_matrix": transform_matrix,
    }

    embeddings = bert_embedding_forward(inputs, params)
    jax.block_until_ready(embeddings)
    assert embeddings.shape == (B, WL, NUM_CONCAT * H), embeddings.shape

    # ----------------------- reference checks (plain JAX) --------------------
    transforms = transform_matrix[:, :WL, :BL]
    hp = jax.lax.Precision.HIGHEST

    # (a) tight check vs. a reference using the same bf16-quantized inputs
    hs_bf16 = synthetic_bert_hidden_states(
        inputs["indices"][:, :BL], inputs["attention_mask"][:, :BL], params,
        out_dtype=jnp.bfloat16)
    bert_x_q = jnp.concatenate(
        [h.astype(jnp.float32) for h in hs_bf16[-NUM_CONCAT:]], axis=-1)
    ref_q = jnp.einsum(
        "bwl,bld->bwd",
        transforms.astype(jnp.bfloat16).astype(jnp.float32),
        bert_x_q, precision=hp)
    assert jnp.allclose(embeddings, ref_q, atol=1e-4, rtol=1e-4)

    # (b) vs. the full-f32 reference (tolerance = bf16 input quantization)
    hs_f32 = synthetic_bert_hidden_states(
        inputs["indices"][:, :BL], inputs["attention_mask"][:, :BL], params,
        out_dtype=jnp.float32)
    bert_x = jnp.concatenate(hs_f32[-NUM_CONCAT:], axis=-1)
    ref_f32 = jnp.einsum("bwl,bld->bwd", transforms, bert_x, precision=hp)
    assert jnp.allclose(embeddings, ref_f32, atol=2e-3, rtol=2e-2)

    print("KERNEL_OK")
</pallas_src>

<mosaic_0001>
module attributes {stable_mosaic.version = 11 : i64} {
  func.func @fused_concat_bmm_kernel(%arg0: i32, %arg1: memref<1x8x128xbf16, #tpu.memory_space<vmem>>, %arg2: memref<1x128x128xbf16, #tpu.memory_space<vmem>>, %arg3: memref<1x128x128xbf16, #tpu.memory_space<vmem>>, %arg4: memref<1x128x128xbf16, #tpu.memory_space<vmem>>, %arg5: memref<1x128x128xbf16, #tpu.memory_space<vmem>>, %arg6: memref<1x128x128xbf16, #tpu.memory_space<vmem>>, %arg7: memref<1x128x128xbf16, #tpu.memory_space<vmem>>, %arg8: memref<1x128x128xbf16, #tpu.memory_space<vmem>>, %arg9: memref<1x128x128xbf16, #tpu.memory_space<vmem>>, %arg10: memref<1x8x1024xf32, #tpu.memory_space<vmem>>, %arg11: memref<128x1024xbf16, #tpu.memory_space<vmem>>) attributes {dimension_semantics = [#tpu.dimension_semantics<parallel>], iteration_bounds = array<i64: 2>, scalar_prefetch = 0 : i64, scratch_operands = 1 : i64, tpu.core_type = #tpu.core_type<tc>, window_params = [{transform_indices = @transform_0, window_bounds = array<i64: 1, 8, 128>}, {transform_indices = @transform_1, window_bounds = array<i64: 1, 128, 128>}, {transform_indices = @transform_2, window_bounds = array<i64: 1, 128, 128>}, {transform_indices = @transform_3, window_bounds = array<i64: 1, 128, 128>}, {transform_indices = @transform_4, window_bounds = array<i64: 1, 128, 128>}, {transform_indices = @transform_5, window_bounds = array<i64: 1, 128, 128>}, {transform_indices = @transform_6, window_bounds = array<i64: 1, 128, 128>}, {transform_indices = @transform_7, window_bounds = array<i64: 1, 128, 128>}, {transform_indices = @transform_8, window_bounds = array<i64: 1, 128, 128>}, {transform_indices = @transform_9, window_bounds = array<i64: 1, 8, 1024>}]} {
    %c0 = arith.constant 0 : index
    %c0_0 = arith.constant 0 : index
    %c0_1 = arith.constant 0 : index
    %0 = vector.load %arg2[%c0, %c0_0, %c0_1] : memref<1x128x128xbf16, #tpu.memory_space<vmem>>, vector<1x128x128xbf16>
    %1 = vector.shape_cast %0 : vector<1x128x128xbf16> to vector<128x128xbf16>
    %c0_2 = arith.constant 0 : index
    %c0_3 = arith.constant 0 : index
    %2 = vector.load %arg11[%c0_2, %c0_3] : memref<128x1024xbf16, #tpu.memory_space<vmem>>, vector<128x128xbf16>
    tpu.vector_store %arg11[%c0_2, %c0_3], %1 {strides = array<i32>} : memref<128x1024xbf16, #tpu.memory_space<vmem>>, vector<128x128xbf16>,
    %c0_4 = arith.constant 0 : index
    %c0_5 = arith.constant 0 : index
    %c0_6 = arith.constant 0 : index
    %3 = vector.load %arg3[%c0_4, %c0_5, %c0_6] : memref<1x128x128xbf16, #tpu.memory_space<vmem>>, vector<1x128x128xbf16>
    %4 = vector.shape_cast %3 : vector<1x128x128xbf16> to vector<128x128xbf16>
    %c0_7 = arith.constant 0 : index
    %c128 = arith.constant 128 : index
    %5 = vector.load %arg11[%c0_7, %c128] : memref<128x1024xbf16, #tpu.memory_space<vmem>>, vector<128x128xbf16>
    tpu.vector_store %arg11[%c0_7, %c128], %4 {strides = array<i32>} : memref<128x1024xbf16, #tpu.memory_space<vmem>>, vector<128x128xbf16>,
    %c0_8 = arith.constant 0 : index
    %c0_9 = arith.constant 0 : index
    %c0_10 = arith.constant 0 : index
    %6 = vector.load %arg4[%c0_8, %c0_9, %c0_10] : memref<1x128x128xbf16, #tpu.memory_space<vmem>>, vector<1x128x128xbf16>
    %7 = vector.shape_cast %6 : vector<1x128x128xbf16> to vector<128x128xbf16>
    %c0_11 = arith.constant 0 : index
    %c256 = arith.constant 256 : index
    %8 = vector.load %arg11[%c0_11, %c256] : memref<128x1024xbf16, #tpu.memory_space<vmem>>, vector<128x128xbf16>
    tpu.vector_store %arg11[%c0_11, %c256], %7 {strides = array<i32>} : memref<128x1024xbf16, #tpu.memory_space<vmem>>, vector<128x128xbf16>,
    %c0_12 = arith.constant 0 : index
    %c0_13 = arith.constant 0 : index
    %c0_14 = arith.constant 0 : index
    %9 = vector.load %arg5[%c0_12, %c0_13, %c0_14] : memref<1x128x128xbf16, #tpu.memory_space<vmem>>, vector<1x128x128xbf16>
    %10 = vector.shape_cast %9 : vector<1x128x128xbf16> to vector<128x128xbf16>
    %c0_15 = arith.constant 0 : index
    %c384 = arith.constant 384 : index
    %11 = vector.load %arg11[%c0_15, %c384] : memref<128x1024xbf16, #tpu.memory_space<vmem>>, vector<128x128xbf16>
    tpu.vector_store %arg11[%c0_15, %c384], %10 {strides = array<i32>} : memref<128x1024xbf16, #tpu.memory_space<vmem>>, vector<128x128xbf16>,
    %c0_16 = arith.constant 0 : index
    %c0_17 = arith.constant 0 : index
    %c0_18 = arith.constant 0 : index
    %12 = vector.load %arg6[%c0_16, %c0_17, %c0_18] : memref<1x128x128xbf16, #tpu.memory_space<vmem>>, vector<1x128x128xbf16>
    %13 = vector.shape_cast %12 : vector<1x128x128xbf16> to vector<128x128xbf16>
    %c0_19 = arith.constant 0 : index
    %c512 = arith.constant 512 : index
    %14 = vector.load %arg11[%c0_19, %c512] : memref<128x1024xbf16, #tpu.memory_space<vmem>>, vector<128x128xbf16>
    tpu.vector_store %arg11[%c0_19, %c512], %13 {strides = array<i32>} : memref<128x1024xbf16, #tpu.memory_space<vmem>>, vector<128x128xbf16>,
    %c0_20 = arith.constant 0 : index
    %c0_21 = arith.constant 0 : index
    %c0_22 = arith.constant 0 : index
    %15 = vector.load %arg7[%c0_20, %c0_21, %c0_22] : memref<1x128x128xbf16, #tpu.memory_space<vmem>>, vector<1x128x128xbf16>
    %16 = vector.shape_cast %15 : vector<1x128x128xbf16> to vector<128x128xbf16>
    %c0_23 = arith.constant 0 : index
    %c640 = arith.constant 640 : index
    %17 = vector.load %arg11[%c0_23, %c640] : memref<128x1024xbf16, #tpu.memory_space<vmem>>, vector<128x128xbf16>
    tpu.vector_store %arg11[%c0_23, %c640], %16 {strides = array<i32>} : memref<128x1024xbf16, #tpu.memory_space<vmem>>, vector<128x128xbf16>,
    %c0_24 = arith.constant 0 : index
    %c0_25 = arith.constant 0 : index
    %c0_26 = arith.constant 0 : index
    %18 = vector.load %arg8[%c0_24, %c0_25, %c0_26] : memref<1x128x128xbf16, #tpu.memory_space<vmem>>, vector<1x128x128xbf16>
    %19 = vector.shape_cast %18 : vector<1x128x128xbf16> to vector<128x128xbf16>
    %c0_27 = arith.constant 0 : index
    %c768 = arith.constant 768 : index
    %20 = vector.load %arg11[%c0_27, %c768] : memref<128x1024xbf16, #tpu.memory_space<vmem>>, vector<128x128xbf16>
    tpu.vector_store %arg11[%c0_27, %c768], %19 {strides = array<i32>} : memref<128x1024xbf16, #tpu.memory_space<vmem>>, vector<128x128xbf16>,
    %c0_28 = arith.constant 0 : index
    %c0_29 = arith.constant 0 : index
    %c0_30 = arith.constant 0 : index
    %21 = vector.load %arg9[%c0_28, %c0_29, %c0_30] : memref<1x128x128xbf16, #tpu.memory_space<vmem>>, vector<1x128x128xbf16>
    %22 = vector.shape_cast %21 : vector<1x128x128xbf16> to vector<128x128xbf16>
    %c0_31 = arith.constant 0 : index
    %c896 = arith.constant 896 : index
    %23 = vector.load %arg11[%c0_31, %c896] : memref<128x1024xbf16, #tpu.memory_space<vmem>>, vector<128x128xbf16>
    tpu.vector_store %arg11[%c0_31, %c896], %22 {strides = array<i32>} : memref<128x1024xbf16, #tpu.memory_space<vmem>>, vector<128x128xbf16>,
    %c0_32 = arith.constant 0 : index
    %c0_33 = arith.constant 0 : index
    %c0_34 = arith.constant 0 : index
    %24 = vector.load %arg1[%c0_32, %c0_33, %c0_34] : memref<1x8x128xbf16, #tpu.memory_space<vmem>>, vector<1x8x128xbf16>
    %25 = vector.shape_cast %24 : vector<1x8x128xbf16> to vector<8x128xbf16>
    %c0_35 = arith.constant 0 : index
    %c0_36 = arith.constant 0 : index
    %26 = vector.load %arg11[%c0_35, %c0_36] : memref<128x1024xbf16, #tpu.memory_space<vmem>>, vector<128x1024xbf16>
    %cst = arith.constant dense<0.000000e+00> : vector<8x1024xf32>
    %27 = tpu.matmul %25, %26, %cst {dimension_numbers = #tpu.dot_dimension_numbers<[1], [0], [0], [1], [0, 0, 1, 1], [], []>} : vector<8x128xbf16>, vector<128x1024xbf16>, vector<8x1024xf32> -> vector<8x1024xf32>
    %c0_37 = arith.constant 0 : index
    %c0_38 = arith.constant 0 : index
    %c0_39 = arith.constant 0 : index
    %28 = vector.load %arg10[%c0_37, %c0_38, %c0_39] : memref<1x8x1024xf32, #tpu.memory_space<vmem>>, vector<1x8x1024xf32>
    %29 = vector.shape_cast %28 : vector<1x8x1024xf32> to vector<8x1024xf32>
    %30 = vector.shape_cast %27 : vector<8x1024xf32> to vector<1x8x1024xf32>
    tpu.vector_store %arg10[%c0_37, %c0_38, %c0_39], %30 {strides = array<i32>} : memref<1x8x1024xf32, #tpu.memory_space<vmem>>, vector<1x8x1024xf32>,
    return
  }
  func.func @transform_0(%arg0: i32) -> (i32, i32, i32) {
    %c0_i32 = arith.constant 0 : i32
    %c0_i32_0 = arith.constant 0 : i32
    %c0_i32_1 = arith.constant 0 : i32
    return %arg0, %c0_i32, %c0_i32_0 : i32, i32, i32
  }
  func.func @transform_1(%arg0: i32) -> (i32, i32, i32) {
    %c0_i32 = arith.constant 0 : i32
    %c0_i32_0 = arith.constant 0 : i32
    %c0_i32_1 = arith.constant 0 : i32
    return %arg0, %c0_i32, %c0_i32_0 : i32, i32, i32
  }
  func.func @transform_2(%arg0: i32) -> (i32, i32, i32) {
    %c0_i32 = arith.constant 0 : i32
    %c0_i32_0 = arith.constant 0 : i32
    %c0_i32_1 = arith.constant 0 : i32
    return %arg0, %c0_i32, %c0_i32_0 : i32, i32, i32
  }
  func.func @transform_3(%arg0: i32) -> (i32, i32, i32) {
    %c0_i32 = arith.constant 0 : i32
    %c0_i32_0 = arith.constant 0 : i32
    %c0_i32_1 = arith.constant 0 : i32
    return %arg0, %c0_i32, %c0_i32_0 : i32, i32, i32
  }
  func.func @transform_4(%arg0: i32) -> (i32, i32, i32) {
    %c0_i32 = arith.constant 0 : i32
    %c0_i32_0 = arith.constant 0 : i32
    %c0_i32_1 = arith.constant 0 : i32
    return %arg0, %c0_i32, %c0_i32_0 : i32, i32, i32
  }
  func.func @transform_5(%arg0: i32) -> (i32, i32, i32) {
    %c0_i32 = arith.constant 0 : i32
    %c0_i32_0 = arith.constant 0 : i32
    %c0_i32_1 = arith.constant 0 : i32
    return %arg0, %c0_i32, %c0_i32_0 : i32, i32, i32
  }
  func.func @transform_6(%arg0: i32) -> (i32, i32, i32) {
    %c0_i32 = arith.constant 0 : i32
    %c0_i32_0 = arith.constant 0 : i32
    %c0_i32_1 = arith.constant 0 : i32
    return %arg0, %c0_i32, %c0_i32_0 : i32, i32, i32
  }
  func.func @transform_7(%arg0: i32) -> (i32, i32, i32) {
    %c0_i32 = arith.constant 0 : i32
    %c0_i32_0 = arith.constant 0 : i32
    %c0_i32_1 = arith.constant 0 : i32
    return %arg0, %c0_i32, %c0_i32_0 : i32, i32, i32
  }
  func.func @transform_8(%arg0: i32) -> (i32, i32, i32) {
    %c0_i32 = arith.constant 0 : i32
    %c0_i32_0 = arith.constant 0 : i32
    %c0_i32_1 = arith.constant 0 : i32
    return %arg0, %c0_i32, %c0_i32_0 : i32, i32, i32
  }
  func.func @transform_9(%arg0: i32) -> (i32, i32, i32) {
    %c0_i32 = arith.constant 0 : i32
    %c0_i32_0 = arith.constant 0 : i32
    %c0_i32_1 = arith.constant 0 : i32
    return %arg0, %c0_i32, %c0_i32_0 : i32, i32, i32
  }
}

</mosaic_0001>

<bundles_post_ra>
// kernel: tpu_custom_call.1
= control target key start
LH: loop header
LB: loop body
LE: loop exit
PB: predicated region body
PF: predicated region fallthrough
CT: control target
= control target key end

     0   :  { %s2995_s0 = inlined_call_operand.hbm [shape: bf16[2,8,128], index: 0, kind: input, shape index: {}]   ;;  %s2996_s1 = inlined_call_operand.hbm [shape: bf16[2,128,128], index: 1, kind: input, shape index: {}]   ;;  %s2997_s2 = inlined_call_operand.hbm [shape: bf16[2,128,128], index: 2, kind: input, shape index: {}]   ;;  %s2998_s3 = inlined_call_operand.hbm [shape: bf16[2,128,128], index: 3, kind: input, shape index: {}]   ;;  %s2999_s4 = inlined_call_operand.hbm [shape: bf16[2,128,128], index: 4, kind: input, shape index: {}]   ;;  %s3000_s5 = inlined_call_operand.hbm [shape: bf16[2,128,128], index: 5, kind: input, shape index: {}]   ;;  %s3001_s6 = inlined_call_operand.hbm [shape: bf16[2,128,128], index: 6, kind: input, shape index: {}]   ;;  %s3002_s7 = inlined_call_operand.hbm [shape: bf16[2,128,128], index: 7, kind: input, shape index: {}]   ;;  %s3003_s8 = inlined_call_operand.hbm [shape: bf16[2,128,128], index: 8, kind: input, shape index: {}]   ;;  %s3004_s9 = inlined_call_operand.hbm [shape: f32[2,8,1024], index: 9, kind: output, shape index: {}]  }
   0x1   :  { %3022 = sst [smem:[#allocation31_spill]] %s2996_s1 }
   0x2   :  { %3023 = sst [smem:[#allocation32_spill]] %s2998_s3 }
   0x3   :  { %3024 = sst [smem:[#allocation33_spill]] %s3000_s5 }
   0x4   :  { %3025 = sst [smem:[#allocation34_spill]] %s3002_s7 }
   0x5   :  { %3026 = sst [smem:[#allocation35_spill]] %s3004_s9 }
   0x6   :  { %14 = vsyncpa [#allocation4], 0 }
   0x7   :  { %16 = vsyncpa [#allocation4 + $0x1], 0 }
   0x8   :  { %17 = vsyncpa [#allocation7], 0 }
   0x9   :  { %19 = vsyncpa [#allocation7 + $0x1], 0 }
   0xa   :  { %20 = vsyncpa [#allocation10], 0 }
   0xb   :  { %22 = vsyncpa [#allocation10 + $0x1], 0 }
   0xc   :  { %23 = vsyncpa [#allocation13], 0 }
   0xd   :  { %25 = vsyncpa [#allocation13 + $0x1], 0 }
   0xe   :  { %26 = vsyncpa [#allocation16], 0 }
   0xf   :  { %28 = vsyncpa [#allocation16 + $0x1], 0 }
  0x10   :  { %29 = vsyncpa [#allocation5], 0 }
  0x11   :  { %31 = vsyncpa [#allocation5 + $0x1], 0  ;;  %s2415_s30 = smov 0   ;;  %s2417_s10 = smov 0  }
  0x12   :  { %s2419_s11 = smov 0   ;;  %s2421_s12 = smov 0  }
  0x13 LB: > { %3027 = sst [smem:[#allocation25_spill]] %s2338_s30  ;;  %s2436_s13 = sadd.s32 4294967295, %s2350_s12   ;;  %s2350_s12 = sphi %s2421_s12, %s3060_s12   ;;  %s2346_s11 = sphi %s2419_s11, %s3062_s11   ;;  %s2342_s10 = sphi %s2417_s10, %s3064_s10   ;;  %s2338_s30 = sphi %s2415_s30, %s3063_s30  }
  0x14   : > { %3028 = sst [smem:[#allocation26_spill]] %s2346_s11  ;;  %s1727_s14 = sadd.s32 4294967294, %s2350_s12  }
  0x15   : > { %s2440_s15 = sadd.s32 1, %s2350_s12   ;;  %s44_s16 = sadd.s32 1, %s2346_s11 }
  0x16   : > { %3029 = sst [smem:[#allocation27_spill]] %s2440_s15  ;;  %s41_s17 = ssub.s32 %s2350_s12, %s2440_s15 }
  0x17   : > { %p51_p0 = scmp.ne.s32.totalorder %s2346_s11, %s2342_s10  ;;  %p42_p1 = scmp.eq.s32.totalorder %s41_s17, 0 }
  0x18   : > { %p52_p2 = scmp.eq.s32.totalorder %s2350_s12, 0  ;;  %p57_p3 = scmp.ne.s32.totalorder %s2342_s10, %s2338_s30 }
  0x19   : > { %p58_p4 = scmp.eq.s32.totalorder %s2436_s13, 0  ;;  %p289_p7 = scmp.eq.s32.totalorder %s2436_s13, 1 }
  0x1a   : > { %s2452_s18 = scalar_select %p42_p1, %s2346_s11, %s44_s16  }
  0x1b   : > { %p53_p5 = por %p52_p2, %p51_p0  ;;  %p2454_p6 = por %p58_p4, %p57_p3 }
  0x1c   : > { %3030 = sst [smem:[#allocation28_spill]] %s2452_s18  ;;  %p295_p8 = scmp.eq.s32.totalorder %s1727_s14, 1 }
  0x1d   : > { %s3031_s19 = scalar_select %p2454_p6, 1, 0 }
  0x1e   : > { %p1897_p10 = scmp.lt.s32.totalorder %s2350_s12, 2  ;;  %p2461_p11 = por %p289_p7, %p51_p0 }
  0x1f   : > { %p2465_p12 = por %p295_p8, %p57_p3  ;;  %s2470_s22 = sand.u32 1, %s2346_s11  }
  0x20   : > { %s3032_s20 = scalar_select %p2461_p11, 1, 0 }
  0x21   : > { %s3034_s21 = scalar_select %p2465_p12, 1, 0 }
  0x22   : > { %3033 = sst [smem:[#allocation29_spill]] %s3032_s20  ;;  %p2472_p13 = pnand %p1897_p10, %p53_p5 }
  0x23   : > { %3035 = sst [smem:[#allocation30_spill]] %s3034_s21  ;;  %s2477_s24 = sand.u32 1, %s2350_s12  }
  0x24   : > { %s2480_s25 = sshll.u32 %s2470_s22, 6  ;;  %s2483_s26 = sshll.u32 %s2350_s12, 10 }
  0x25   : > { %s3037_s1 = sld [smem:[#allocation31_spill]]  ;;  %s337_s14 = scalar_lea.vmem [#allocation6], %s2480_s25 }
  0x26   : > { %s344_s16 = sshll.u32 %s337_s14, 4  ;;  %p2500_p2 = pneg %p2472_p13  ;;  %s2492_s16 = int_to_ptr.vmem [resolvable:$true] %s344_s16 }
  0x2b   : > { %s2489_s29 = scalar_lea.hbm %s3037_s1, %s2483_s26  ;;  %s2003_s15 = scalar_lea.hbm %s3037_s1, 2048 }
  0x2c   : > { %s1998_s18 = scalar_lea.hbm %s2489_s29, 1024  ;;  %p2004_p5 = scmp.lt.u32.totalorder %s2489_s29, %s3037_s1 }
  0x2d   : > { %p1999_p1 = scmp.ne.s32.totalorder %s2489_s29, %s1998_s18  ;;  %p2005_p7 = scmp.lt.u32.totalorder %s2003_s15, %s1998_s18 }
  0x2e   : > { %p2007_p10 = scmp.lt.u32.totalorder %s1998_s18, %s2489_s29 }
  0x2f   : > { %p2001_p3 = pnand %p2500_p2, %p1999_p1  ;;  %p2006_p8 = por %p2005_p7, %p2004_p5 }
  0x31   : > { %p2002_p4 = pneg %p2001_p3  ;;  %p2008_p9 = por %p2007_p10, %p2006_p8 }
  0x33   : > { %p2009_p0 = pnand %p2008_p9, %p2002_p4 }
  0x35   : > { %2012 = shalt.err (!%p2009_p0)
}
  0x36   : > { %s2013_s17 = scalar_lea.vmem %s2492_s16, 1024  ;;  %s2352_s27 = smov [#allocation6]  }
  0x37   : > { %p2014_p1 = scmp.ne.s32.totalorder %s2492_s16, %s2013_s17  ;;  %s2018_s28 = sshll.u32 %s2352_s27, 4  ;;  %s2019_s28 = int_to_ptr.vmem [resolvable:$false] %s2018_s28 }
  0x38   : > { %s2020_s21 = scalar_lea.vmem %s2019_s28, 2048  ;;  %p2021_p11 = scmp.lt.s32.totalorder %s2492_s16, %s2019_s28 }
  0x39   : > { %p2016_p3 = pnand %p2014_p1, %p2500_p2  ;;  %p2022_p6 = scmp.lt.s32.totalorder %s2020_s21, %s2013_s17 }
  0x3b   : > { %p2017_p12 = pneg %p2016_p3  ;;  %p2023_p5 = por %p2022_p6, %p2021_p11 }
  0x3d   : > { %p2024_p7 = pnand %p2023_p5, %p2017_p12 }
  0x3f   : > { %2027 = shalt.err (!%p2024_p7)
}
  0x40   : > { %s3012_s15 = smov 64   ;;  %s3014_s18 = smov 4  }
  0x41   : > { %s3039_s17 = scalar_lea.sflag [#allocation7], %s2477_s24  ;;  %p499_p6 = scmp.lt.s32.totalorder %s2350_s12, 3 }
  0x42   : > { %1871 = dma.hbm_to_vmem [thread:$0]  (!%p2472_p13), %s2489_s29, 1024, %s2492_s16, %s3039_s17, %s3012_s15, %s3012_s15, %s3014_s18  }
  0x43   : > { %s3040_s3 = sld [smem:[#allocation32_spill]]  ;;  %p3041_p9 = scmp.ge.s32.totalorder %s2350_s12, 1 }
  0x44   : > { %s379_s1 = scalar_lea.vmem [#allocation9], %s2480_s25  ;;  %s3017_s29 = scalar_lea.sflag [#allocation10], %s2477_s24 }
  0x45   : > { %p2537_p11 = pnand %p3041_p9, %p499_p6  ;;  %s386_s30 = sshll.u32 %s379_s1, 4  ;;  %s2542_s30 = int_to_ptr.vmem [resolvable:$true] %s386_s30 }
  0x47   : > { %s3042_s21 = scalar_select %p2537_p11, 1, 0 }
  0x49   : > { %s2533_s28 = scalar_lea.hbm %s3040_s3, %s2483_s26  ;;  %s2033_s27 = scalar_lea.hbm %s3040_s3, 2048 }
  0x4a   : > { %s2028_s16 = scalar_lea.hbm %s2533_s28, 1024  ;;  %p2034_p8 = scmp.lt.u32.totalorder %s2533_s28, %s3040_s3 }
  0x4b   : > { %p2029_p12 = scmp.ne.s32.totalorder %s2533_s28, %s2028_s16  ;;  %p2035_p10 = scmp.lt.u32.totalorder %s2033_s27, %s2028_s16 }
  0x4c   : > { %p2037_p3 = scmp.lt.u32.totalorder %s2028_s16, %s2533_s28 }
  0x4d   : > { %p2031_p0 = pnand %p2029_p12, %p2500_p2  ;;  %p2036_p1 = por %p2035_p10, %p2034_p8 }
  0x4f   : > { %p2032_p4 = pneg %p2031_p0  ;;  %p2038_p5 = por %p2037_p3, %p2036_p1 }
  0x51   : > { %p2039_p7 = pnand %p2038_p5, %p2032_p4 }
  0x53   : > { %2042 = shalt.err (!%p2039_p7)
}
  0x54   : > { %s2043_s1 = scalar_lea.vmem %s2542_s30, 1024  ;;  %s2355_s17 = smov [#allocation9]  }
  0x55   : > { %p2044_p6 = scmp.ne.s32.totalorder %s2542_s30, %s2043_s1  ;;  %s2048_s14 = sshll.u32 %s2355_s17, 4  ;;  %s2049_s14 = int_to_ptr.vmem [resolvable:$false] %s2048_s14 }
  0x56   : > { %s2050_s15 = scalar_lea.vmem %s2049_s14, 2048  ;;  %p2051_p0 = scmp.lt.s32.totalorder %s2542_s30, %s2049_s14 }
  0x57   : > { %p2046_p9 = pnand %p2044_p6, %p2500_p2  ;;  %p2052_p11 = scmp.lt.s32.totalorder %s2050_s15, %s2043_s1 }
  0x59   : > { %p2047_p12 = pneg %p2046_p9  ;;  %p2053_p8 = por %p2052_p11, %p2051_p0 }
  0x5b   : > { %p2054_p10 = pnand %p2053_p8, %p2047_p12 }
  0x5d   : > { %2057 = shalt.err (!%p2054_p10)
}
  0x5e   : > { %s3043_s18 = smov 4   ;;  %s3044_s16 = smov 64  }
  0x5f   : > { %1877 = dma.hbm_to_vmem [thread:$0]  (!%p2472_p13), %s2533_s28, 1024, %s2542_s30, %s3017_s29, %s3044_s16, %s3044_s16, %s3043_s18  }
  0x60   : > { %s3045_s5 = sld [smem:[#allocation33_spill]]  ;;  %s421_s14 = scalar_lea.vmem [#allocation12], %s2480_s25 }
  0x61   : > { %s428_s15 = sshll.u32 %s421_s14, 4  ;;  %s3018_s3 = scalar_lea.sflag [#allocation13], %s2477_s24  ;;  %s2578_s15 = int_to_ptr.vmem [resolvable:$true] %s428_s15 }
  0x66   : > { %s2575_s1 = scalar_lea.hbm %s3045_s5, %s2483_s26  ;;  %s2063_s27 = scalar_lea.hbm %s3045_s5, 2048 }
  0x67   : > { %s2058_s9 = scalar_lea.hbm %s2575_s1, 1024  ;;  %p2064_p3 = scmp.lt.u32.totalorder %s2575_s1, %s3045_s5 }
  0x68   : > { %p2059_p11 = scmp.ne.s32.totalorder %s2575_s1, %s2058_s9  ;;  %p2065_p5 = scmp.lt.u32.totalorder %s2063_s27, %s2058_s9 }
  0x69   : > { %p2067_p6 = scmp.lt.u32.totalorder %s2058_s9, %s2575_s1 }
  0x6a   : > { %p2061_p4 = pnand %p2059_p11, %p2500_p2  ;;  %p2066_p7 = por %p2065_p5, %p2064_p3 }
  0x6c   : > { %p2062_p1 = pneg %p2061_p4  ;;  %p2068_p9 = por %p2067_p6, %p2066_p7 }
  0x6e   : > { %p2069_p12 = pnand %p2068_p9, %p2062_p1 }
  0x70   : > { %2072 = shalt.err (!%p2069_p12)
}
  0x71   : > { %s2073_s14 = scalar_lea.vmem %s2578_s15, 1024  ;;  %s2356_s30 = smov [#allocation12]  }
  0x72   : > { %p2074_p0 = scmp.ne.s32.totalorder %s2578_s15, %s2073_s14  ;;  %s2078_s28 = sshll.u32 %s2356_s30, 4  ;;  %s2079_s28 = int_to_ptr.vmem [resolvable:$false] %s2078_s28 }
  0x73   : > { %s2080_s29 = scalar_lea.vmem %s2079_s28, 2048  ;;  %p2081_p11 = scmp.lt.s32.totalorder %s2578_s15, %s2079_s28 }
  0x74   : > { %p2076_p8 = pnand %p2074_p0, %p2500_p2  ;;  %p2082_p4 = scmp.lt.s32.totalorder %s2080_s29, %s2073_s14 }
  0x76   : > { %p2077_p10 = pneg %p2076_p8  ;;  %p2083_p3 = por %p2082_p4, %p2081_p11 }
  0x78   : > { %p2084_p5 = pnand %p2083_p3, %p2077_p10 }
  0x7a   : > { %2087 = shalt.err (!%p2084_p5)
}
  0x7b   : > { %1883 = dma.hbm_to_vmem [thread:$0]  (!%p2472_p13), %s2575_s1, 1024, %s2578_s15, %s3018_s3, %s3044_s16, %s3044_s16, %s3043_s18  }
  0x7c   : > { %s3046_s7 = sld [smem:[#allocation34_spill]]  ;;  %s463_s14 = scalar_lea.vmem [#allocation15], %s2480_s25 }
  0x7d   : > { %s470_s30 = sshll.u32 %s463_s14, 4  ;;  %s3021_s28 = scalar_lea.sflag [#allocation16], %s2477_s24  ;;  %s2614_s30 = int_to_ptr.vmem [resolvable:$true] %s470_s30 }
  0x82   : > { %s2611_s17 = scalar_lea.hbm %s3046_s7, %s2483_s26  ;;  %s2093_s9 = scalar_lea.hbm %s3046_s7, 2048 }
  0x83   : > { %s2088_s29 = scalar_lea.hbm %s2611_s17, 1024  ;;  %p2094_p9 = scmp.lt.u32.totalorder %s2611_s17, %s3046_s7 }
  0x84   : > { %p2089_p1 = scmp.ne.s32.totalorder %s2611_s17, %s2088_s29  ;;  %p2095_p12 = scmp.lt.u32.totalorder %s2093_s9, %s2088_s29 }
  0x85   : > { %p2097_p8 = scmp.lt.u32.totalorder %s2088_s29, %s2611_s17 }
  0x86   : > { %p2091_p7 = pnand %p2089_p1, %p2500_p2  ;;  %p2096_p0 = por %p2095_p12, %p2094_p9 }
  0x88   : > { %p2092_p6 = pneg %p2091_p7  ;;  %p2098_p10 = por %p2097_p8, %p2096_p0 }
  0x8a   : > { %p2099_p11 = pnand %p2098_p10, %p2092_p6 }
  0x8c   : > { %2102 = shalt.err (!%p2099_p11)
}
  0x8d   : > { %s2103_s14 = scalar_lea.vmem %s2614_s30, 1024  ;;  %s2357_s1 = smov [#allocation15]  }
  0x8e   : > { %p2104_p4 = scmp.ne.s32.totalorder %s2614_s30, %s2103_s14  ;;  %s2108_s15 = sshll.u32 %s2357_s1, 4  ;;  %s2109_s15 = int_to_ptr.vmem [resolvable:$false] %s2108_s15 }
  0x8f   : > { %s2110_s3 = scalar_lea.vmem %s2109_s15, 2048  ;;  %p2111_p1 = scmp.lt.s32.totalorder %s2614_s30, %s2109_s15 }
  0x90   : > { %p2106_p3 = pnand %p2104_p4, %p2500_p2  ;;  %p2112_p7 = scmp.lt.s32.totalorder %s2110_s3, %s2103_s14 }
  0x92   : > { %p2107_p5 = pneg %p2106_p3  ;;  %p2113_p9 = por %p2112_p7, %p2111_p1 }
  0x94   : > { %p2114_p12 = pnand %p2113_p9, %p2107_p5 }
  0x96   : > { %2117 = shalt.err (!%p2114_p12)
}
  0x97   : > { %1889 = dma.hbm_to_vmem [thread:$0]  (!%p2472_p13), %s2611_s17, 1024, %s2614_s30, %s3021_s28, %s3044_s16, %s3044_s16, %s3043_s18  }
  0x98   : > { %s1730_s29 = sshll.u32 %s2470_s22, 2  ;;  %s1731_s9 = sshll.u32 %s2350_s12, 6 }
  0x99   : > { %s2648_s1 = scalar_lea.hbm %s2995_s0, %s1731_s9  ;;  %s319_s15 = scalar_lea.vmem [#allocation3], %s1730_s29 }
  0x9a   : > { %s326_s3 = sshll.u32 %s319_s15, 4  ;;  %s2656_s20 = scalar_lea.hbm %s2997_s2, %s2483_s26  ;;  %s2650_s3 = int_to_ptr.vmem [resolvable:$true] %s326_s3 }
  0x9b   : > { %s316_s17 = scalar_lea.sflag [#allocation4], %s2470_s22  ;;  %s2118_s30 = scalar_lea.hbm %s2648_s1, 64 }
  0x9c   : > { %p2119_p6 = scmp.ne.s32.totalorder %s2648_s1, %s2118_s30  ;;  %s2123_s14 = scalar_lea.hbm %s2995_s0, 128 }
  0x9d   : > { %p2124_p10 = scmp.lt.u32.totalorder %s2648_s1, %s2995_s0  ;;  %p2125_p11 = scmp.lt.u32.totalorder %s2123_s14, %s2118_s30 }
  0x9e   : > { %p2121_p0 = pnand %p2119_p6, %p2500_p2  ;;  %p2127_p3 = scmp.lt.u32.totalorder %s2118_s30, %s2648_s1 }
  0x9f   : > { %p2126_p4 = por %p2125_p11, %p2124_p10 }
  0xa0   : > { %p2122_p8 = pneg %p2121_p0 }
  0xa1   : > { %p2128_p5 = por %p2127_p3, %p2126_p4 }
  0xa3   : > { %p2129_p1 = pnand %p2128_p5, %p2122_p8 }
  0xa5   : > { %2132 = shalt.err (!%p2129_p1)
}
  0xa6   : > { %s2133_s5 = scalar_lea.vmem %s2650_s3, 64  ;;  %s2358_s7 = smov [#allocation3]  }
  0xa7   : > { %p2134_p7 = scmp.ne.s32.totalorder %s2650_s3, %s2133_s5  ;;  %s2138_s22 = sshll.u32 %s2358_s7, 4  ;;  %s2139_s22 = int_to_ptr.vmem [resolvable:$false] %s2138_s22 }
  0xa8   : > { %s2140_s28 = scalar_lea.vmem %s2139_s22, 128  ;;  %p2141_p6 = scmp.lt.s32.totalorder %s2650_s3, %s2139_s22 }
  0xa9   : > { %p2136_p9 = pnand %p2134_p7, %p2500_p2  ;;  %p2142_p0 = scmp.lt.s32.totalorder %s2140_s28, %s2133_s5 }
  0xab   : > { %p2137_p12 = pneg %p2136_p9  ;;  %p2143_p10 = por %p2142_p0, %p2141_p6 }
  0xad   : > { %p2144_p11 = pnand %p2143_p10, %p2137_p12 }
  0xaf   : > { %2147 = shalt.err (!%p2144_p11)
}
  0xb0   : > { %1868 = dma.hbm_to_vmem [thread:$0]  (!%p2472_p13), %s2648_s1, 64, %s2650_s3, %s316_s17  }
  0xb1   : > { %s358_s15 = scalar_lea.vmem [#allocation8], %s2480_s25  ;;  %s2687_s14 = scalar_lea.hbm %s2999_s4, %s2483_s26 }
  0xb2   : > { %s365_s30 = sshll.u32 %s358_s15, 4  ;;  %s2148_s29 = scalar_lea.hbm %s2656_s20, 1024  ;;  %s2681_s30 = int_to_ptr.vmem [resolvable:$true] %s365_s30 }
  0xb3   : > { %p2149_p8 = scmp.ne.s32.totalorder %s2656_s20, %s2148_s29  ;;  %s2153_s22 = scalar_lea.hbm %s2997_s2, 2048 }
  0xb4   : > { %p2154_p5 = scmp.lt.u32.totalorder %s2656_s20, %s2997_s2  ;;  %p2155_p1 = scmp.lt.u32.totalorder %s2153_s22, %s2148_s29 }
  0xb5   : > { %p2151_p4 = pnand %p2149_p8, %p2500_p2  ;;  %p2157_p9 = scmp.lt.u32.totalorder %s2148_s29, %s2656_s20 }
  0xb6   : > { %p2156_p7 = por %p2155_p1, %p2154_p5 }
  0xb7   : > { %p2152_p3 = pneg %p2151_p4 }
  0xb8   : > { %p2158_p12 = por %p2157_p9, %p2156_p7 }
  0xba   : > { %p2159_p6 = pnand %p2158_p12, %p2152_p3 }
  0xbc   : > { %2162 = shalt.err (!%p2159_p6)
}
  0xbd   : > { %s2163_s3 = scalar_lea.vmem %s2681_s30, 1024  ;;  %s2359_s17 = smov [#allocation8]  }
  0xbe   : > { %p2164_p0 = scmp.ne.s32.totalorder %s2681_s30, %s2163_s3  ;;  %s2168_s15 = sshll.u32 %s2359_s17, 4  ;;  %s2169_s15 = int_to_ptr.vmem [resolvable:$false] %s2168_s15 }
  0xbf   : > { %s2170_s9 = scalar_lea.vmem %s2169_s15, 2048  ;;  %p2171_p8 = scmp.lt.s32.totalorder %s2681_s30, %s2169_s15 }
  0xc0   : > { %p2166_p10 = pnand %p2164_p0, %p2500_p2  ;;  %p2172_p4 = scmp.lt.s32.totalorder %s2170_s9, %s2163_s3 }
  0xc2   : > { %p2167_p11 = pneg %p2166_p10  ;;  %p2173_p5 = por %p2172_p4, %p2171_p8 }
  0xc4   : > { %p2174_p1 = pnand %p2173_p5, %p2167_p11 }
  0xc6   : > { %2177 = shalt.err (!%p2174_p1)
}
  0xc7   : > { %s3047_s27 = scalar_lea.sflag [#allocation7], %s2477_s24  ;;  %s400_s29 = scalar_lea.vmem [#allocation11], %s2480_s25 }
  0xc8   : > { %1874 = dma.hbm_to_vmem [thread:$0]  (!%p2472_p13), %s2656_s20, 1024, %s2681_s30, %s3047_s27, %s3044_s16, %s3044_s16, %s3043_s18  }
  0xc9   : > { %s407_s5 = sshll.u32 %s400_s29, 4  ;;  %s2722_s28 = scalar_lea.hbm %s3001_s6, %s2483_s26  ;;  %s2716_s5 = int_to_ptr.vmem [resolvable:$true] %s407_s5 }
  0xca   : > { %s2178_s1 = scalar_lea.hbm %s2687_s14, 1024  ;;  %s2183_s15 = scalar_lea.hbm %s2999_s4, 2048 }
  0xcb   : > { %p2179_p3 = scmp.ne.s32.totalorder %s2687_s14, %s2178_s1  ;;  %p2184_p12 = scmp.lt.u32.totalorder %s2687_s14, %s2999_s4 }
  0xcc   : > { %p2185_p6 = scmp.lt.u32.totalorder %s2183_s15, %s2178_s1  ;;  %p2187_p10 = scmp.lt.u32.totalorder %s2178_s1, %s2687_s14 }
  0xcd   : > { %p2181_p7 = pnand %p2179_p3, %p2500_p2 }
  0xce   : > { %p2186_p0 = por %p2185_p6, %p2184_p12 }
  0xcf   : > { %p2182_p9 = pneg %p2181_p7 }
  0xd0   : > { %p2188_p11 = por %p2187_p10, %p2186_p0 }
  0xd2   : > { %p2189_p8 = pnand %p2188_p11, %p2182_p9 }
  0xd4   : > { %2192 = shalt.err (!%p2189_p8)
}
  0xd5   : > { %s2193_s30 = scalar_lea.vmem %s2716_s5, 1024  ;;  %s2360_s27 = smov [#allocation11]  }
  0xd6   : > { %p2194_p4 = scmp.ne.s32.totalorder %s2716_s5, %s2193_s30  ;;  %s2198_s29 = sshll.u32 %s2360_s27, 4  ;;  %s2199_s29 = int_to_ptr.vmem [resolvable:$false] %s2198_s29 }
  0xd7   : > { %s2200_s7 = scalar_lea.vmem %s2199_s29, 2048  ;;  %p2201_p3 = scmp.lt.s32.totalorder %s2716_s5, %s2199_s29 }
  0xd8   : > { %p2196_p5 = pnand %p2194_p4, %p2500_p2  ;;  %p2202_p7 = scmp.lt.s32.totalorder %s2200_s7, %s2193_s30 }
  0xda   : > { %p2197_p1 = pneg %p2196_p5  ;;  %p2203_p12 = por %p2202_p7, %p2201_p3 }
  0xdc   : > { %p2204_p6 = pnand %p2203_p12, %p2197_p1 }
  0xde   : > { %2207 = shalt.err (!%p2204_p6)
}
  0xdf   : > { %s3048_s22 = scalar_lea.sflag [#allocation10], %s2477_s24  ;;  %s442_s1 = scalar_lea.vmem [#allocation14], %s2480_s25 }
  0xe0   : > { %1880 = dma.hbm_to_vmem [thread:$0]  (!%p2472_p13), %s2687_s14, 1024, %s2716_s5, %s3048_s22, %s3044_s16, %s3044_s16, %s3043_s18  }
  0xe1   : > { %s449_s3 = sshll.u32 %s442_s1, 4  ;;  %s2757_s9 = scalar_lea.hbm %s3003_s8, %s2483_s26  ;;  %s2751_s3 = int_to_ptr.vmem [resolvable:$true] %s449_s3 }
  0xe2   : > { %s2208_s20 = scalar_lea.hbm %s2722_s28, 1024  ;;  %s2213_s29 = scalar_lea.hbm %s3001_s6, 2048 }
  0xe3   : > { %p2209_p9 = scmp.ne.s32.totalorder %s2722_s28, %s2208_s20  ;;  %p2214_p11 = scmp.lt.u32.totalorder %s2722_s28, %s3001_s6 }
  0xe4   : > { %p2215_p8 = scmp.lt.u32.totalorder %s2213_s29, %s2208_s20  ;;  %p2217_p5 = scmp.lt.u32.totalorder %s2208_s20, %s2722_s28 }
  0xe5   : > { %p2211_p0 = pnand %p2209_p9, %p2500_p2 }
  0xe6   : > { %p2216_p4 = por %p2215_p8, %p2214_p11 }
  0xe7   : > { %p2212_p10 = pneg %p2211_p0 }
  0xe8   : > { %p2218_p1 = por %p2217_p5, %p2216_p4 }
  0xea   : > { %p2219_p3 = pnand %p2218_p1, %p2212_p10 }
  0xec   : > { %2222 = shalt.err (!%p2219_p3)
}
  0xed   : > { %s2223_s26 = scalar_lea.vmem %s2751_s3, 1024  ;;  %s2361_s5 = smov [#allocation14]  }
  0xee   : > { %p2224_p7 = scmp.ne.s32.totalorder %s2751_s3, %s2223_s26  ;;  %s2228_s22 = sshll.u32 %s2361_s5, 4  ;;  %s2229_s22 = int_to_ptr.vmem [resolvable:$false] %s2228_s22 }
  0xef   : > { %s2230_s1 = scalar_lea.vmem %s2229_s22, 2048  ;;  %p2231_p9 = scmp.lt.s32.totalorder %s2751_s3, %s2229_s22 }
  0xf0   : > { %p2226_p12 = pnand %p2224_p7, %p2500_p2  ;;  %p2232_p0 = scmp.lt.s32.totalorder %s2230_s1, %s2223_s26 }
  0xf2   : > { %p2227_p6 = pneg %p2226_p12  ;;  %p2233_p11 = por %p2232_p0, %p2231_p9 }
  0xf4   : > { %p2234_p8 = pnand %p2233_p11, %p2227_p6 }
  0xf6   : > { %2237 = shalt.err (!%p2234_p8)
}
  0xf7   : > { %s3049_s17 = scalar_lea.sflag [#allocation13], %s2477_s24  ;;  %s484_s15 = scalar_lea.vmem [#allocation17], %s2480_s25 }
  0xf8   : > { %1886 = dma.hbm_to_vmem [thread:$0]  (!%p2472_p13), %s2722_s28, 1024, %s2751_s3, %s3049_s17, %s3044_s16, %s3044_s16, %s3043_s18  }
  0xf9   : > { %s491_s20 = sshll.u32 %s484_s15, 4  ;;  %s2238_s30 = scalar_lea.hbm %s2757_s9, 1024  ;;  %s2786_s20 = int_to_ptr.vmem [resolvable:$true] %s491_s20 }
  0xfa   : > { %p2239_p10 = scmp.ne.s32.totalorder %s2757_s9, %s2238_s30  ;;  %s2243_s7 = scalar_lea.hbm %s3003_s8, 2048 }
  0xfb   : > { %p2244_p1 = scmp.lt.u32.totalorder %s2757_s9, %s3003_s8  ;;  %p2245_p3 = scmp.lt.u32.totalorder %s2243_s7, %s2238_s30 }
  0xfc   : > { %p2241_p4 = pnand %p2239_p10, %p2500_p2  ;;  %p2247_p12 = scmp.lt.u32.totalorder %s2238_s30, %s2757_s9 }
  0xfd   : > { %p2246_p7 = por %p2245_p3, %p2244_p1 }
  0xfe   : > { %p2242_p5 = pneg %p2241_p4 }
  0xff   : > { %p2248_p6 = por %p2247_p12, %p2246_p7 }
 0x101   : > { %p2249_p9 = pnand %p2248_p6, %p2242_p5 }
 0x103   : > { %2252 = shalt.err (!%p2249_p9)
}
 0x104   : > { %s2253_s25 = scalar_lea.vmem %s2786_s20, 1024  ;;  %s2362_s28 = smov [#allocation17]  }
 0x105   : > { %p2254_p0 = scmp.ne.s32.totalorder %s2786_s20, %s2253_s25  ;;  %s2258_s3 = sshll.u32 %s2362_s28, 4  ;;  %s2259_s3 = int_to_ptr.vmem [resolvable:$false] %s2258_s3 }
 0x106   : > { %s2260_s5 = scalar_lea.vmem %s2259_s3, 2048  ;;  %p2261_p10 = scmp.lt.s32.totalorder %s2786_s20, %s2259_s3 }
 0x107   : > { %p2256_p11 = pnand %p2254_p0, %p2500_p2  ;;  %p2262_p4 = scmp.lt.s32.totalorder %s2260_s5, %s2253_s25 }
 0x109   : > { %p2257_p8 = pneg %p2256_p11  ;;  %p2263_p1 = por %p2262_p4, %p2261_p10 }
 0x10b   : > { %p2264_p3 = pnand %p2263_p1, %p2257_p8 }
 0x10d   : > { %2267 = shalt.err (!%p2264_p3)
}
 0x10e   : > { %s3050_s22 = scalar_lea.sflag [#allocation16], %s2477_s24  ;;  %p3051_p2 = scmp.ne.s32.totalorder %s3042_s21, 0 }
 0x10f   : > { %1892 = dma.hbm_to_vmem [thread:$0]  (!%p2472_p13), %s2757_s9, 1024, %s2786_s20, %s3050_s22, %s3044_s16, %s3044_s16, %s3043_s18  }
 0x110   : > { %503 = sbr.rel (%p3051_p2) target bundleno = 587 (0x24b), region = 56  ;;  %s2817_s11 = sand.u32 (!%p3051_p2), 1, %s2342_s10  }
 0x111   : > { %s1757_s1 = sshll.u32 (!%p3051_p2), %s2817_s11, 2  ;;  %s506_s17 = scalar_lea.sflag (!%p3051_p2), [#allocation4], %s2817_s11 }
 0x112   : > { %s2821_s23 = scalar_lea.vmem (!%p3051_p2), [#allocation3], %s1757_s1  ;;  %p3052_p5 = scmp.ne.s32.totalorder (!%p3051_p2), %s3031_s19, 0 }
 0x117   : > { %2313 = dma.done.wait (%p3052_p5), %s506_s17, 64  }
 0x118   : > { %2315 = vsyncadd (%p3052_p5), %s506_s17, 4294967232  ;;  %s514_s24 = sand.u32 1, %s2436_s13   ;;  %s2829_s21 = sshll.u32 %s2817_s11, 6 }
 0x119   : > { %s515_s18 = scalar_lea.sflag [#allocation7], %s514_s24  ;;  %s2832_s16 = scalar_lea.vmem [#allocation6], %s2829_s21 }
 0x11a   : > { %2317 = dma.done.wait (%p3052_p5), %s515_s18, 2048  }
 0x11b   : > { %2319 = vsyncadd (%p3052_p5), %s515_s18, 4294965248  ;;  %s2839_s9 = scalar_lea.vmem [#allocation8], %s2829_s21  ;;  %s533_s15 = scalar_lea.sflag [#allocation10], %s514_s24 }
 0x11c   : > { %s2842_s20 = scalar_lea.vmem [#allocation9], %s2829_s21 }
 0x11d   : > { %2321 = dma.done.wait (%p3052_p5), %s533_s15, 2048  }
 0x11e   : > { %2323 = vsyncadd (%p3052_p5), %s533_s15, 4294965248  ;;  %s2849_s30 = scalar_lea.vmem [#allocation11], %s2829_s21  ;;  %s551_s27 = scalar_lea.sflag [#allocation13], %s514_s24 }
 0x11f   : > { %s2852_s29 = scalar_lea.vmem [#allocation12], %s2829_s21 }
 0x120   : > { %2325 = dma.done.wait (%p3052_p5), %s551_s27, 2048  }
 0x121   : > { %2327 = vsyncadd (%p3052_p5), %s551_s27, 4294965248  ;;  %s2859_s7 = scalar_lea.vmem [#allocation14], %s2829_s21  ;;  %s569_s14 = scalar_lea.sflag [#allocation16], %s514_s24 }
 0x122   : > { %s2862_s26 = scalar_lea.vmem [#allocation15], %s2829_s21 }
 0x123   : > { %2329 = dma.done.wait (%p3052_p5), %s569_s14, 2048  }
 0x124   : > { %2331 = vsyncadd (%p3052_p5), %s569_s14, 4294965248  ;;  %v2363_v0 = vmov 0   ;;  %v1934_v1 = vld [vmem:[%s2839_s9] sm:$0xff]   ;;  %v1938_v5 = vld [vmem:[%s2839_s9 + $0x8] sm:$0xff]   ;;  %s2907_s19 = scalar_lea.vmem [#allocation17], %s2829_s21  ;;  %s655_s25 = scalar_lea.vmem [#allocation18], %s2829_s21 }
 0x125   : > { %1330 = vmatprep.mubr.bf16.mxu0 %v2363_v0  ;;  %1371 = vmatprep.mubr.bf16.mxu1 %v2363_v0  ;;  %v1935_v2 = vld [vmem:[%s2849_s30] sm:$0xff]   ;;  %v1939_v6 = vld [vmem:[%s2849_s30 + $0x8] sm:$0xff]   ;;  %v1942_v9 = vld [vmem:[%s2839_s9 + $0x10] sm:$0xff]   ;;  %s1844_s28 = sshll.u32 %s2436_s13, 10  ;;  %s1485_s3 = sshll.u32 %s655_s25, 4  ;;  %s2953_s3 = int_to_ptr.vmem [resolvable:$true] %s1485_s3 }
 0x126   : > { %1298 = vmatprep.subr.bf16.mxu0 %v1934_v1  ;;  %v1936_v3 = vld [vmem:[%s2832_s16] sm:$0xff]   ;;  %1339 = vmatprep.subr.bf16.mxu1 %v1935_v2  ;;  %v1940_v7 = vld [vmem:[%s2832_s16 + $0x8] sm:$0xff]   ;;  %v1943_v10 = vld [vmem:[%s2849_s30 + $0x10] sm:$0xff]   ;;  %s3053_s5 = sld [smem:[#allocation29_spill]]  ;;  %s3054_s17 = sld [smem:[#allocation35_spill]] }
 0x127   : > { %v1937_v4 = vld [vmem:[%s2842_s20] sm:$0xff]   ;;  %1299 = vmatpush1.bf16.msra.mxu0 %v1936_v3  ;;  %v1941_v8 = vld [vmem:[%s2842_s20 + $0x8] sm:$0xff]   ;;  %v1944_v11 = vld [vmem:[%s2832_s16 + $0x10] sm:$0xff]   ;;  %s1471_s13 = scalar_lea.sflag [#allocation5], %s2817_s11  ;;  %s2268_s24 = scalar_lea.vmem %s2953_s3, 1024 }
 0x128   : > { %1340 = vmatpush1.bf16.msra.mxu1 %v1937_v4  ;;  %1300 = vmatprep.subr.bf16.mxu0 %v1938_v5  ;;  %v1945_v12 = vld [vmem:[%s2842_s20 + $0x10] sm:$0xff]   ;;  %v1946_v13 = vld [vmem:[%s2839_s9 + $0x18] sm:$0xff]   ;;  %v1950_v17 = vld [vmem:[%s2839_s9 + $0x20] sm:$0xff]   ;;  %p2269_p13 = scmp.ne.s32.totalorder %s2953_s3, %s2268_s24  ;;  %s2364_s21 = smov [#allocation18]  }
 0x129   : > { %1341 = vmatprep.subr.bf16.mxu1 %v1939_v6  ;;  %v1947_v14 = vld [vmem:[%s2849_s30 + $0x18] sm:$0xff]   ;;  %v1951_v18 = vld [vmem:[%s2849_s30 + $0x20] sm:$0xff]   ;;  %v1954_v21 = vld [vmem:[%s2839_s9 + $0x28] sm:$0xff]   ;;  %s2272_s18 = sshll.u32 %s2364_s21, 4  ;;  %s2273_s18 = int_to_ptr.vmem [resolvable:$false] %s2272_s18 }
 0x12a   : > { %v1948_v15 = vld [vmem:[%s2832_s16 + $0x18] sm:$0xff]   ;;  %v1952_v19 = vld [vmem:[%s2832_s16 + $0x20] sm:$0xff]   ;;  %v1955_v22 = vld [vmem:[%s2849_s30 + $0x28] sm:$0xff]   ;;  %p2275_p9 = scmp.lt.s32.totalorder %s2953_s3, %s2273_s18 }
 0x12b   : > { %1301 = vmatpush1.bf16.msra.mxu0 %v1940_v7  ;;  %v1949_v16 = vld [vmem:[%s2842_s20 + $0x18] sm:$0xff]   ;;  %v1953_v20 = vld [vmem:[%s2842_s20 + $0x20] sm:$0xff]   ;;  %v1956_v23 = vld [vmem:[%s2832_s16 + $0x28] sm:$0xff]  }
 0x12c   : > { %1342 = vmatpush1.bf16.msra.mxu1 %v1941_v8  ;;  %1302 = vmatprep.subr.bf16.mxu0 %v1942_v9  ;;  %v1957_v24 = vld [vmem:[%s2842_s20 + $0x28] sm:$0xff]   ;;  %v1958_v25 = vld [vmem:[%s2839_s9 + $0x30] sm:$0xff]   ;;  %v1962_v29 = vld [vmem:[%s2839_s9 + $0x38] sm:$0xff]   ;;  %p3055_p7 = scmp.ne.s32.totalorder %s3053_s5, 0 }
 0x12d   : > { %1343 = vmatprep.subr.bf16.mxu1 %v1943_v10  ;;  %v1959_v26 = vld [vmem:[%s2849_s30 + $0x30] sm:$0xff]   ;;  %v1963_v30 = vld [vmem:[%s2849_s30 + $0x38] sm:$0xff]   ;;  %v1966_v34 = vld [vmem:[%s2859_s7] sm:$0xff]  }
 0x12e   : > { %v1960_v27 = vld [vmem:[%s2832_s16 + $0x30] sm:$0xff]   ;;  %v1964_v31 = vld [vmem:[%s2832_s16 + $0x38] sm:$0xff]   ;;  %v1967_v35 = vld [vmem:[%s2907_s19] sm:$0xff]   ;;  %p2270_p12 = pnand %p2269_p13, %p3055_p7  ;;  %s2274_s16 = scalar_lea.vmem %s2273_s18, 2048 }
 0x12f   : > { %1303 = vmatpush1.bf16.msra.mxu0 %v1944_v11  ;;  %v1961_v28 = vld [vmem:[%s2842_s20 + $0x30] sm:$0xff]   ;;  %v1965_v32 = vld [vmem:[%s2842_s20 + $0x38] sm:$0xff]   ;;  %v1968_v36 = vld [vmem:[%s2852_s29] sm:$0xff]   ;;  %p2276_p0 = scmp.lt.s32.totalorder %s2274_s16, %s2268_s24 }
 0x130   : > { %1344 = vmatpush1.bf16.msra.mxu1 %v1945_v12  ;;  %1304 = vmatprep.subr.bf16.mxu0 %v1946_v13  ;;  %v2903_v33 = vld [vmem:[%s2821_s23] sm:$0xf]  ;;  %v1969_v37 = vld [vmem:[%s2862_s26] sm:$0xff]   ;;  %v1970_v38 = vld [vmem:[%s2859_s7 + $0x8] sm:$0xff]   ;;  %s2951_s23 = scalar_lea.hbm %s3054_s17, %s1844_s28  ;;  %p2271_p6 = pneg %p2270_p12 }
 0x131   : > { %1345 = vmatprep.subr.bf16.mxu1 %v1947_v14  ;;  %v1971_v39 = vld [vmem:[%s2907_s19 + $0x8] sm:$0xff]   ;;  %v1974_v42 = vld [vmem:[%s2859_s7 + $0x10] sm:$0xff]   ;;  %v1978_v46 = vld [vmem:[%s2859_s7 + $0x18] sm:$0xff]   ;;  %p2277_p11 = por %p2276_p0, %p2275_p9 }
 0x132   : > { %v1972_v40 = vld [vmem:[%s2852_s29 + $0x8] sm:$0xff]   ;;  %v1975_v43 = vld [vmem:[%s2907_s19 + $0x10] sm:$0xff]   ;;  %v1979_v47 = vld [vmem:[%s2907_s19 + $0x18] sm:$0xff]  }
 0x133   : > { %1305 = vmatpush1.bf16.msra.mxu0 %v1948_v15  ;;  %v1973_v41 = vld [vmem:[%s2862_s26 + $0x8] sm:$0xff]   ;;  %v1976_v44 = vld [vmem:[%s2852_s29 + $0x10] sm:$0xff]   ;;  %v1980_v48 = vld [vmem:[%s2852_s29 + $0x18] sm:$0xff]   ;;  %p2278_p8 = pnand %p2277_p11, %p2271_p6 }
 0x134   : > { %1346 = vmatpush1.bf16.msra.mxu1 %v1949_v16  ;;  %1306 = vmatprep.subr.bf16.mxu0 %v1950_v17  ;;  %v1977_v45 = vld [vmem:[%s2862_s26 + $0x10] sm:$0xff]   ;;  %v1981_v49 = vld [vmem:[%s2862_s26 + $0x18] sm:$0xff]   ;;  %v1982_v50 = vld [vmem:[%s2859_s7 + $0x20] sm:$0xff]  }
 0x135   : > { %1347 = vmatprep.subr.bf16.mxu1 %v1951_v18  ;;  %v1983_v51 = vld [vmem:[%s2907_s19 + $0x20] sm:$0xff]   ;;  %v1986_v54 = vld [vmem:[%s2859_s7 + $0x28] sm:$0xff]   ;;  %v1990_v58 = vld [vmem:[%s2859_s7 + $0x30] sm:$0xff]  }
 0x136   : > { %v1984_v52 = vld [vmem:[%s2852_s29 + $0x20] sm:$0xff]   ;;  %v1987_v55 = vld [vmem:[%s2907_s19 + $0x28] sm:$0xff]   ;;  %v1991_v59 = vld [vmem:[%s2907_s19 + $0x30] sm:$0xff]  }
 0x137   : > { %1307 = vmatpush1.bf16.msra.mxu0 %v1952_v19  ;;  %v1985_v53 = vld [vmem:[%s2862_s26 + $0x20] sm:$0xff]   ;;  %v1988_v56 = vld [vmem:[%s2852_s29 + $0x28] sm:$0xff]   ;;  %v1992_v60 = vld [vmem:[%s2852_s29 + $0x30] sm:$0xff]  }
 0x138   : > { %1348 = vmatpush1.bf16.msra.mxu1 %v1953_v20  ;;  %1308 = vmatprep.subr.bf16.mxu0 %v1954_v21  ;;  %v1989_v57 = vld [vmem:[%s2862_s26 + $0x28] sm:$0xff]   ;;  %v1993_v61 = vld [vmem:[%s2862_s26 + $0x30] sm:$0xff]   ;;  %v1994_v62 = vld [vmem:[%s2859_s7 + $0x38] sm:$0xff]  }
 0x139   : > { %1349 = vmatprep.subr.bf16.mxu1 %v1955_v22  ;;  %v1995_v63 = vld [vmem:[%s2907_s19 + $0x38] sm:$0xff]  }
 0x13a   : > { %v1997_v1 = vld [vmem:[%s2862_s26 + $0x38] sm:$0xff]  }
 0x13b   : > { %1309 = vmatpush1.bf16.msra.mxu0 %v1956_v23 }
 0x13c   : > { %1350 = vmatpush1.bf16.msra.mxu1 %v1957_v24  ;;  %1310 = vmatprep.subr.bf16.mxu0 %v1958_v25 }
 0x13d   : > { %1351 = vmatprep.subr.bf16.mxu1 %v1959_v26 }
 0x13f   : > { %1311 = vmatpush1.bf16.msra.mxu0 %v1960_v27 }
 0x140   : > { %1352 = vmatpush1.bf16.msra.mxu1 %v1961_v28  ;;  %1312 = vmatprep.subr.bf16.mxu0 %v1962_v29 }
 0x141   : > { %1353 = vmatprep.subr.bf16.mxu1 %v1963_v30 }
 0x143   : > { %1313 = vmatpush1.bf16.msra.mxu0 %v1964_v31 }
 0x144   : > { %1354 = vmatpush1.bf16.msra.mxu1 %v1965_v32  ;;  %1380 = vmatprep.subr.bf16.mxu0 %v1966_v34 }
 0x145   : > { %1421 = vmatprep.subr.bf16.mxu1 %v1967_v35 }
 0x146   : > { %1331 = vmatmul.mubr.bf16.vlgmr.msra.gmra.mrb[0].mxu0 %v2903_v33 }
 0x147   : > { %1372 = vmatmul.mubr.bf16.vlgmr.msra.gmra.mrb[0].mxu1 %v2903_v33  ;;  %1381 = vmatpush1.bf16.msra.mxu0 %v1968_v36 }
 0x148   : > { %1412 = vmatprep.mubr.bf16.mxu0 %v2363_v0  ;;  %1422 = vmatpush1.bf16.msra.mxu1 %v1969_v37 }
 0x149   : > { %1453 = vmatprep.mubr.bf16.mxu1 %v2363_v0  ;;  %1382 = vmatprep.subr.bf16.mxu0 %v1970_v38  ;;  %v1996_v0 = vld [vmem:[%s2852_s29 + $0x38] sm:$0xff]  }
 0x14a   : > { %1423 = vmatprep.subr.bf16.mxu1 %v1971_v39 }
 0x14b   : > { %1383 = vmatpush1.bf16.msra.mxu0 %v1972_v40 }
 0x14c   : > { %1424 = vmatpush1.bf16.msra.mxu1 %v1973_v41  ;;  %1384 = vmatprep.subr.bf16.mxu0 %v1974_v42 }
 0x14d   : > { %1425 = vmatprep.subr.bf16.mxu1 %v1975_v43 }
 0x14f   : > { %1385 = vmatpush1.bf16.msra.mxu0 %v1976_v44 }
 0x150   : > { %1426 = vmatpush1.bf16.msra.mxu1 %v1977_v45  ;;  %1386 = vmatprep.subr.bf16.mxu0 %v1978_v46 }
 0x151   : > { %1427 = vmatprep.subr.bf16.mxu1 %v1979_v47 }
 0x153   : > { %1387 = vmatpush1.bf16.msra.mxu0 %v1980_v48 }
 0x154   : > { %1428 = vmatpush1.bf16.msra.mxu1 %v1981_v49  ;;  %1388 = vmatprep.subr.bf16.mxu0 %v1982_v50 }
 0x155   : > { %1429 = vmatprep.subr.bf16.mxu1 %v1983_v51 }
 0x157   : > { %1389 = vmatpush1.bf16.msra.mxu0 %v1984_v52 }
 0x158   : > { %1430 = vmatpush1.bf16.msra.mxu1 %v1985_v53  ;;  %1390 = vmatprep.subr.bf16.mxu0 %v1986_v54 }
 0x159   : > { %1431 = vmatprep.subr.bf16.mxu1 %v1987_v55 }
 0x15b   : > { %1391 = vmatpush1.bf16.msra.mxu0 %v1988_v56 }
 0x15c   : > { %1432 = vmatpush1.bf16.msra.mxu1 %v1989_v57  ;;  %1392 = vmatprep.subr.bf16.mxu0 %v1990_v58 }
 0x15d   : > { %1433 = vmatprep.subr.bf16.mxu1 %v1991_v59 }
 0x15f   : > { %1393 = vmatpush1.bf16.msra.mxu0 %v1992_v60 }
 0x160   : > { %1434 = vmatpush1.bf16.msra.mxu1 %v1993_v61  ;;  %1394 = vmatprep.subr.bf16.mxu0 %v1994_v62 }
 0x161   : > { %1435 = vmatprep.subr.bf16.mxu1 %v1995_v63 }
 0x163   : > { %1395 = vmatpush1.bf16.msra.mxu0 %v1996_v0 }
 0x164   : > { %1436 = vmatpush1.bf16.msra.mxu1 %v1997_v1 }
 0x166   : > { %1413 = vmatmul.mubr.bf16.vlgmr.msra.gmra.mrb[4].mxu0 %v2903_v33 }
 0x167   : > { %1454 = vmatmul.mubr.bf16.vlgmr.msra.gmra.mrb[4].mxu1 %v2903_v33 }
 0x219   : > { %v1332_v2 = vpop.f32.mrb[0].mxu0 }
 0x21a   : > { %1462 = vst [vmem:[%s655_s25] sm:$0xff] %v1332_v2  ;;  %v1373_v3 = vpop.f32.mrb[0].mxu1  ;;  %v1334_v4 = vpop.f32.mrb[1].mxu0 }
 0x21b   : > { %1464 = vst [vmem:[%s655_s25 + $0x10] sm:$0xff] %v1373_v3  ;;  %1463 = vst [vmem:[%s655_s25 + $0x8] sm:$0xff] %v1334_v4  ;;  %v1375_v5 = vpop.f32.mrb[1].mxu1  ;;  %v1336_v6 = vpop.f32.mrb[2].mxu0 }
 0x21c   : > { %1465 = vst [vmem:[%s655_s25 + $0x18] sm:$0xff] %v1375_v5  ;;  %v1377_v7 = vpop.f32.mrb[2].mxu1  ;;  %v1337_v8 = vpop.f32.mrb[3].mxu0 }
 0x21d   : > { %v1378_v9 = vpop.f32.mrb[3].mxu1 }
 0x239   : > { %v1414_v10 = vpop.f32.mrb[4].mxu0 }
 0x23a   : > { %1466 = vst [vmem:[%s655_s25 + $0x20] sm:$0xff] %v1414_v10  ;;  %v1455_v11 = vpop.f32.mrb[4].mxu1  ;;  %v1416_v12 = vpop.f32.mrb[5].mxu0 }
 0x23b   : > { %1468 = vst [vmem:[%s655_s25 + $0x30] sm:$0xff] %v1455_v11  ;;  %1467 = vst [vmem:[%s655_s25 + $0x28] sm:$0xff] %v1416_v12  ;;  %v1457_v13 = vpop.f32.mrb[5].mxu1  ;;  %v1418_v14 = vpop.f32.mrb[6].mxu0 }
 0x23c   : > { %1469 = vst [vmem:[%s655_s25 + $0x38] sm:$0xff] %v1457_v13  ;;  %v1459_v15 = vpop.f32.mrb[6].mxu1  ;;  %v1419_v16 = vpop.f32.mrb[7].mxu0 }
 0x23d   : > { %v1460_v17 = vpop.f32.mrb[7].mxu1 }
 0x23e   : > { %2281 = shalt.err (!%p2278_p8)
}
 0x23f   : > { %s2282_s11 = scalar_lea.hbm %s2951_s23, 1024  ;;  %s2286_s20 = scalar_lea.hbm %s3054_s17, 2048 }
 0x240   : > { %p2283_p10 = scmp.ne.s32.totalorder %s2951_s23, %s2282_s11  ;;  %p2287_p3 = scmp.lt.u32.totalorder %s2951_s23, %s3054_s17 }
 0x241   : > { %p2288_p2 = scmp.lt.u32.totalorder %s2286_s20, %s2282_s11  ;;  %p2290_p13 = scmp.lt.u32.totalorder %s2282_s11, %s2951_s23 }
 0x242   : > { %p2284_p4 = pnand %p2283_p10, %p3055_p7 }
 0x243   : > { %p2289_p5 = por %p2288_p2, %p2287_p3 }
 0x244   : > { %p2285_p1 = pneg %p2284_p4 }
 0x245   : > { %p2291_p12 = por %p2290_p13, %p2289_p5 }
 0x247   : > { %p2292_p6 = pnand %p2291_p12, %p2285_p1 }
 0x249   : > { %2295 = shalt.err (!%p2292_p6)
}
 0x24a   : > { %1863 = dma.vmem_to_hbm [thread:$0]  (%p3055_p7), %s2953_s3, 1024, %s2951_s23, %s1471_s13  }
 0x24b PF: > { %s3056_s29 = sld [smem:[#allocation25_spill]]  ;;  %s3057_s7 = sld [smem:[#allocation30_spill]] }
 0x24c   : > { %p3059_p0 = scmp.ge.s32.totalorder %s2350_s12, 2 }
 0x251   : > { %s1497_s14 = sand.u32 1, %s3056_s29   ;;  %p3058_p9 = scmp.ne.s32.totalorder %s3057_s7, 0 }
 0x252   : > { %s1498_s26 = scalar_lea.sflag [#allocation5], %s1497_s14 }
 0x253   : > { %p1894_p11 = pnand %p3059_p0, %p3058_p9 }
 0x255   : > { %2333 = dma.done.wait (!%p1894_p11), %s1498_s26, 1024  }
 0x256   : > { %2335 = vsyncadd (!%p1894_p11), %s1498_s26, 4294966272  ;;  %s3060_s12 = sld [smem:[#allocation27_spill]]  ;;  %s3061_s19 = sld [smem:[#allocation26_spill]] }
 0x257   : > { %s3062_s11 = sld [smem:[#allocation28_spill]]  ;;  %s3063_s30 = smov %s2342_s10 }
 0x25c   : > { %p34_p8 = scmp.ge.s32.totalorder %s3060_s12, 4   ;;  %s3064_s10 = smov %s3061_s19 }
 0x25e   :  { %36 = sbr.rel (!%p34_p8) target bundleno = 19 (0x13), region = 197 }
 0x265   :  { %1503 = vsyncpa [#allocation4], 1 }
 0x266   :  { %1505 = vsyncpa [#allocation4 + $0x1], 1 }
 0x267   :  { %1506 = vsyncpa [#allocation7], 1 }
 0x268   :  { %1508 = vsyncpa [#allocation7 + $0x1], 1 }
 0x269   :  { %1509 = vsyncpa [#allocation10], 1 }
 0x26a   :  { %1511 = vsyncpa [#allocation10 + $0x1], 1 }
 0x26b   :  { %1512 = vsyncpa [#allocation13], 1 }
 0x26c   :  { %1514 = vsyncpa [#allocation13 + $0x1], 1 }
 0x26d   :  { %1515 = vsyncpa [#allocation16], 1 }
 0x26e   :  { %1517 = vsyncpa [#allocation16 + $0x1], 1 }
 0x26f   :  { %1518 = vsyncpa [#allocation5], 1 }
 0x270   :  { %1520 = vsyncpa [#allocation5 + $0x1], 1 }

</bundles_post_ra>
